<compile_context>
chip_gen: v5e
topology: v5e:2x2
jax: 0.10.0
libtpu: 0.0.40
codegen_flags: <defaults>
</compile_context>

<pallas_src>
import functools

import jax
import jax.numpy as jnp
from jax.experimental import pallas as pl
from jax.experimental.pallas import tpu as pltpu


def _focal_loss_kernel(logits_ref, targets_ref, out_ref, *,
                       gamma, n_rows, tile_n, steps_per_partial, needs_mask):
    p = pl.program_id(0)      # partial-sum slot ("parallel": one per TensorCore on v7x)
    i = pl.program_id(1)      # row-tile step within this partial ("arbitrary")

    @pl.when(i == 0)
    def _init():
        out_ref[...] = jnp.zeros_like(out_ref)

    x = logits_ref[...].astype(jnp.float32)     # (T, C) logits, cast on-chip
    t = targets_ref[...]                        # (T, 1) int32 targets

    # Numerically stable log-sum-exp pieces.
    m = jnp.max(x, axis=-1, keepdims=True)                         # (T, 1)
    z = x - m                                                      # (T, C)
    sumexp = jnp.sum(jnp.exp(z), axis=-1, keepdims=True)           # (T, 1)

    # Gather the target-class (shifted) logit with a one-hot mask (no dynamic
    # gather on TPU).
    # TODO(synk): if profiling shows the XLU saturated on v6e/v7x, offload this
    # lane-sum (and sumexp) to the idle MXU via jnp.dot with a ones/onehot matrix.
    cls_ids = jax.lax.broadcasted_iota(jnp.int32, x.shape, 1)      # (T, C)
    z_tgt = jnp.sum(jnp.where(cls_ids == t, z, 0.0), axis=-1, keepdims=True)

    # Per-sample cross entropy (weight=None) and pt = exp(-ce): exact softmax prob
    # of the target via a narrow (T, 1) EUP exp -- no wide ez gather / reciprocal.
    # TODO(synk): per-class `weight` vector of F.cross_entropy is not plumbed in
    # (module default is weight=None).
    ce = jnp.log(sumexp) - z_tgt                                   # (T, 1)
    pt = jnp.exp(-ce)                                              # (T, 1)

    g = 1.0 - pt
    if float(gamma) == 2.0:
        w = g * g                               # single VPU mul, no pow / extra EUP
    elif float(gamma).is_integer() and gamma >= 0:
        w = jnp.ones_like(g)
        for _ in range(int(gamma)):
            w = w * g
    else:
        # Clamp avoids log(negative) -> NaN if rounding ever makes pt > 1.
        w = jnp.power(jnp.maximum(g, 0.0), jnp.float32(gamma))

    focal = w * ce                                                 # (T, 1)

    if needs_mask:
        # Only emitted when the padded grid covers more rows than N.  Narrow (T, 1)
        # iota/compare/select; must stay *before* the reduction so NaNs from stale
        # rows in the partial/empty tiles are discarded by the select.
        blk = p * steps_per_partial + i
        row_ids = blk * tile_n + jax.lax.broadcasted_iota(jnp.int32, focal.shape, 0)
        focal = jnp.where(row_ids < n_rows, focal, 0.0)

    out_ref[...] += jnp.sum(focal).reshape(1, 1, 1)


def _auto_tile_n(n, c, in_dtype, budget_bytes=20 << 20):
    """Row-tile sized so the double-buffered working set stays ~20 MiB."""
    in_bytes = jnp.dtype(in_dtype).itemsize
    c_pad = max(128, ((c + 127) // 128) * 128)
    # 2 pipeline buffers of native-dtype logits + ~4 live f32 (T, C) intermediates
    # + lane-padded (T, 1) target/stat columns.
    bytes_per_row = c_pad * (2 * in_bytes + 16) + 2 * 128 * 4
    t = int(budget_bytes // max(1, bytes_per_row))
    t = max(16, min(1024, t))
    t -= t % 16            # multiple of 16 (covers bf16 sublane packing)
    if t >= n:
        return n           # single block == full array (no divisibility constraint)
    return t


def focal_loss(inputs, targets, *, alpha=1.0, gamma=2.0, reduction="mean",
               tile_n=None, num_partials=2):
    """inputs: (N, C) float logits (any float dtype); targets: (N,) int indices."""
    n, c = inputs.shape
    in_bytes = jnp.dtype(inputs.dtype).itemsize

    # TODO(synk): vocab-scale C (e.g. 32k) needs an inner C-tiling loop with an
    # online log-sum-exp (rows x C-chunks grid, resident (T,1) m/l scratch); here a
    # full (tile_n, C) row block is assumed to fit VMEM.
    if tile_n is None:
        tile_n = _auto_tile_n(n, c, inputs.dtype)
    else:
        tile_n = int(min(tile_n, n))
        if tile_n < n:
            tile_n = max(8, tile_n - tile_n % 8)

    num_row_blocks = pl.cdiv(n, tile_n)
    num_partials = max(1, min(int(num_partials), num_row_blocks))
    steps = pl.cdiv(num_row_blocks, num_partials)
    needs_mask = (num_partials * steps * tile_n) != n

    # TODO(synk): targets could be DMA'd lane-dense ((1, tile_n) blocks) and moved
    # to sublane orientation in-kernel to reclaim the 128-lane padding of this
    # (tile_n, 1) block; kept sublane-oriented here to avoid the in-kernel relayout.
    targets_2d = targets.astype(jnp.int32).reshape(n, 1)

    kernel = functools.partial(
        _focal_loss_kernel, gamma=float(gamma), n_rows=n, tile_n=tile_n,
        steps_per_partial=steps, needs_mask=needs_mask)

    # Explicit scoped-VMEM limit: defaults are only 16/32/32 MiB (v5e/v6e/v7x).
    c_pad = max(128, ((c + 127) // 128) * 128)
    est_bytes = tile_n * (c_pad * (2 * in_bytes + 16) + 2 * 128 * 4)
    vmem_limit = int(min(64 << 20, max(32 << 20, (est_bytes * 3) // 2)))

    # TODO(synk): on v6e/v7x the max/subtract could be done in bf16 for bf16 callers
    # (packed VPU) at slightly looser numerics; kept f32 here for exactness.
    partials = pl.pallas_call(
        kernel,
        out_shape=jax.ShapeDtypeStruct((num_partials, 1, 1), jnp.float32),
        grid_spec=pltpu.PrefetchScalarGridSpec(
            num_scalar_prefetch=0,
            grid=(num_partials, steps),
            in_specs=[
                pl.BlockSpec((tile_n, c), lambda p, i: (p * steps + i, 0)),  # logits
                pl.BlockSpec((tile_n, 1), lambda p, i: (p * steps + i, 0)),  # targets
            ],
            # One resident accumulator block per partial (per TensorCore on v7x).
            out_specs=pl.BlockSpec((1, 1, 1), lambda p, i: (p, 0, 0)),
        ),
        compiler_params=pltpu.CompilerParams(
            dimension_semantics=("parallel", "arbitrary"),
            vmem_limit_bytes=vmem_limit,
        ),
    )(inputs, targets_2d)

    total = jnp.sum(partials)
    if reduction == "mean":
        return total * jnp.float32(float(alpha) / n)
    elif reduction == "sum":
        return total * jnp.float32(float(alpha))
    else:
        # TODO(synk): reduction='none' needs a per-row (N,) output; not emitted here.
        raise NotImplementedError("reduction='none' is not implemented")


def _focal_loss_ref(inputs, targets, alpha=1.0, gamma=2.0):
    # Pure-JAX reference mirroring the PyTorch module.
    logp = jax.nn.log_softmax(inputs.astype(jnp.float32), axis=-1)
    ce = -jnp.take_along_axis(logp, targets[:, None].astype(jnp.int32), axis=-1)[:, 0]
    pt = jnp.exp(-ce)
    return jnp.mean(alpha * (1.0 - pt) ** gamma * ce)


if __name__ == "__main__":
    key = jax.random.PRNGKey(0)
    k1, k2, k3, k4 = jax.random.split(key, 4)

    # Case 1: small f32 problem -> auto tile, single block, single partial.
    N1, C1 = 8, 10
    logits1 = jax.random.normal(k1, (N1, C1), dtype=jnp.float32) * 2.0
    targets1 = jax.random.randint(k2, (N1,), 0, C1, dtype=jnp.int32)
    out1 = jax.block_until_ready(focal_loss(logits1, targets1, alpha=1.0, gamma=2.0))
    ref1 = _focal_loss_ref(logits1, targets1)
    assert jnp.allclose(out1, ref1, atol=1e-3, rtol=1e-3), (out1, ref1)

    # Case 2: bf16 logits, explicit tile -> 2 partials x 2 steps, masked partial tile.
    N2, C2 = 200, 32
    logits2 = (jax.random.normal(k3, (N2, C2), dtype=jnp.float32) * 2.0).astype(jnp.bfloat16)
    targets2 = jax.random.randint(k4, (N2,), 0, C2, dtype=jnp.int32)
    out2 = jax.block_until_ready(focal_loss(logits2, targets2, tile_n=64))
    ref2 = _focal_loss_ref(logits2, targets2)
    assert jnp.allclose(out2, ref2, atol=1e-3, rtol=1e-3), (out2, ref2)

    print("KERNEL_OK")
</pallas_src>

<mosaic_0001>
module attributes {stable_mosaic.version = 11 : i64} {
  func.func @_focal_loss_kernel(%arg0: i32, %arg1: i32, %arg2: memref<8x10xf32, #tpu.memory_space<vmem>>, %arg3: memref<8x1xi32, #tpu.memory_space<vmem>>, %arg4: memref<1x1x1xf32, #tpu.memory_space<vmem>>) attributes {dimension_semantics = [#tpu.dimension_semantics<parallel>, #tpu.dimension_semantics<arbitrary>], iteration_bounds = array<i64: 1, 1>, scalar_prefetch = 0 : i64, scratch_operands = 0 : i64, tpu.core_type = #tpu.core_type<tc>, window_params = [{transform_indices = @transform_0, window_bounds = array<i64: 8, 10>}, {transform_indices = @transform_1, window_bounds = array<i64: 8, 1>}, {transform_indices = @transform_2, window_bounds = array<i64: 1, 1, 1>}]} {
    %c0_i32 = arith.constant 0 : i32
    %0 = arith.cmpi eq, %arg1, %c0_i32 : i32
    %1 = arith.extui %0 : i1 to i32
    %c0_i32_0 = arith.constant 0 : i32
    %2 = arith.cmpi ne, %1, %c0_i32_0 : i32
    scf.if %2 {
      %cst_16 = arith.constant 0.000000e+00 : f32
      %36 = vector.broadcast %cst_16 : f32 to vector<1x1x1xf32>
      %c0_17 = arith.constant 0 : index
      %c0_18 = arith.constant 0 : index
      %c0_19 = arith.constant 0 : index
      %37 = vector.load %arg4[%c0_17, %c0_18, %c0_19] : memref<1x1x1xf32, #tpu.memory_space<vmem>>, vector<1x1x1xf32>
      tpu.vector_store %arg4[%c0_17, %c0_18, %c0_19], %36 {strides = array<i32>} : memref<1x1x1xf32, #tpu.memory_space<vmem>>, vector<1x1x1xf32>,
    } else {
    }
    %c0 = arith.constant 0 : index
    %c0_1 = arith.constant 0 : index
    %3 = vector.load %arg2[%c0, %c0_1] : memref<8x10xf32, #tpu.memory_space<vmem>>, vector<8x10xf32>
    %c0_2 = arith.constant 0 : index
    %c0_3 = arith.constant 0 : index
    %4 = vector.load %arg3[%c0_2, %c0_3] : memref<8x1xi32, #tpu.memory_space<vmem>>, vector<8x1xi32>
    %cst = arith.constant dense<0xFF800000> : vector<8xf32>
    %5 = vector.multi_reduction <maximumf>, %3, %cst [1] : vector<8x10xf32> to vector<8xf32>
    %6 = vector.shape_cast %5 : vector<8xf32> to vector<8x1xf32>
    %7 = vector.broadcast %6 : vector<8x1xf32> to vector<8x10xf32>
    %8 = arith.subf %3, %7 : vector<8x10xf32>
    %9 = math.exp %8 : vector<8x10xf32>
    %cst_4 = arith.constant dense<0.000000e+00> : vector<8xf32>
    %10 = vector.multi_reduction <add>, %9, %cst_4 [1] : vector<8x10xf32> to vector<8xf32>
    %11 = vector.shape_cast %10 : vector<8xf32> to vector<8x1xf32>
    %12 = tpu.iota {dimensions = array<i32: 1>} : vector<8x10xi32>
    %13 = vector.broadcast %4 : vector<8x1xi32> to vector<8x10xi32>
    %14 = arith.cmpi eq, %12, %13 : vector<8x10xi32>
    %cst_5 = arith.constant 0.000000e+00 : f32
    %15 = vector.broadcast %cst_5 : f32 to vector<8x10xf32>
    %16 = arith.select %14, %8, %15 : vector<8x10xi1>, vector<8x10xf32>
    %cst_6 = arith.constant dense<0.000000e+00> : vector<8xf32>
    %17 = vector.multi_reduction <add>, %16, %cst_6 [1] : vector<8x10xf32> to vector<8xf32>
    %18 = vector.shape_cast %17 : vector<8xf32> to vector<8x1xf32>
    %19 = math.log %11 : vector<8x1xf32>
    %20 = arith.subf %19, %18 : vector<8x1xf32>
    %cst_7 = arith.constant 0.000000e+00 : f32
    %21 = vector.broadcast %cst_7 : f32 to vector<8x1xf32>
    %22 = arith.subf %21, %20 : vector<8x1xf32>
    %23 = math.exp %22 : vector<8x1xf32>
    %cst_8 = arith.constant 1.000000e+00 : f32
    %24 = vector.broadcast %cst_8 : f32 to vector<8x1xf32>
    %25 = arith.subf %24, %23 : vector<8x1xf32>
    %26 = arith.mulf %25, %25 : vector<8x1xf32>
    %27 = arith.mulf %26, %20 : vector<8x1xf32>
    %c0_9 = arith.constant 0 : index
    %c0_10 = arith.constant 0 : index
    %c0_11 = arith.constant 0 : index
    %28 = vector.load %arg4[%c0_9, %c0_10, %c0_11] : memref<1x1x1xf32, #tpu.memory_space<vmem>>, vector<1x1x1xf32>
    %29 = vector.shape_cast %27 : vector<8x1xf32> to vector<1x8x1xf32>
    %cst_12 = arith.constant dense<0.000000e+00> : vector<1xf32>
    %30 = vector.multi_reduction <add>, %29, %cst_12 [1, 2] : vector<1x8x1xf32> to vector<1xf32>
    %31 = vector.shape_cast %30 : vector<1xf32> to vector<1x1x1xf32>
    %32 = vector.extract %31[0, 0, 0] : f32 from vector<1x1x1xf32>
    %33 = vector.broadcast %32 : f32 to vector<1x1x1xf32>
    %34 = arith.addf %28, %33 : vector<1x1x1xf32>
    %c0_13 = arith.constant 0 : index
    %c0_14 = arith.constant 0 : index
    %c0_15 = arith.constant 0 : index
    %35 = vector.load %arg4[%c0_13, %c0_14, %c0_15] : memref<1x1x1xf32, #tpu.memory_space<vmem>>, vector<1x1x1xf32>
    tpu.vector_store %arg4[%c0_13, %c0_14, %c0_15], %34 {strides = array<i32>} : memref<1x1x1xf32, #tpu.memory_space<vmem>>, vector<1x1x1xf32>,
    return
  }
  func.func @transform_0(%arg0: i32, %arg1: i32) -> (i32, i32) {
    %c1_i32 = arith.constant 1 : i32
    %0 = arith.muli %arg0, %c1_i32 : i32
    %1 = arith.addi %0, %arg1 : i32
    %c0_i32 = arith.constant 0 : i32
    %c0_i32_0 = arith.constant 0 : i32
    return %1, %c0_i32 : i32, i32
  }
  func.func @transform_1(%arg0: i32, %arg1: i32) -> (i32, i32) {
    %c1_i32 = arith.constant 1 : i32
    %0 = arith.muli %arg0, %c1_i32 : i32
    %1 = arith.addi %0, %arg1 : i32
    %c0_i32 = arith.constant 0 : i32
    %c0_i32_0 = arith.constant 0 : i32
    return %1, %c0_i32 : i32, i32
  }
  func.func @transform_2(%arg0: i32, %arg1: i32) -> (i32, i32, i32) {
    %c0_i32 = arith.constant 0 : i32
    %c0_i32_0 = arith.constant 0 : i32
    %c0_i32_1 = arith.constant 0 : i32
    return %arg0, %c0_i32, %c0_i32_0 : i32, i32, i32
  }
}

</mosaic_0001>

<bundles_post_ra>
// kernel: tpu_custom_call.1
= control target key start
LH: loop header
LB: loop body
LE: loop exit
PB: predicated region body
PF: predicated region fallthrough
CT: control target
= control target key end

     0   :  { %vm54_vm0 = vcmask 80896   ;;  %s197_s0 = inlined_call_operand.vmem [shape: f32[8,10], index: 0, kind: input, shape index: {}]   ;;  %s198_s1 = inlined_call_operand.vmem [shape: s32[8,1], index: 1, kind: input, shape index: {}]   ;;  %s199_s2 = inlined_call_operand.hbm [shape: f32[1,1,1], index: 2, kind: output, shape index: {}]  }
   0x1   :  { %v52_v0 = vld [vmem:[%s197_s0] sm:$0xff] }
   0x2   :  { %7 = vsyncpa [#allocation3], 0  ;;  %v55_v1 = vsel %vm54_vm0, %v52_v0, -inf  ;;  %v165_v2 = vmov 0   ;;  %v53_v3 = vld [vmem:[%s198_s1] sm:$0xff]  ;;  %v64_v9 = vlaneseq  ;;  %vm84_vm2 = vcmask 7168  }
   0x3   :  { %132 = vset.pattern.permute.xlu0 %v165_v2  ;;  %vm50_vm3 = vcmask 0   ;;  %v166_v26 = vmov 0.0   ;;  %s167_s0 = smov [#allocation2]   ;;  %s106_s15 = sshll.u32 %s199_s2, 4  ;;  %s107_s15 = int_to_ptr.hbm [resolvable:$true] %s106_s15 }
   0x4   :  { %56 = vmax.xlane.f32.xlu0 %v55_v1  ;;  %v65_v10 = vand.u32 127, %v64_v9  ;;  %51 = vst.msk [vmem:[#allocation2] sm:$0x1] %vm50_vm3, %v166_v26  ;;  %s104_s1 = sshll.u32 %s167_s0, 4  ;;  %s105_s1 = int_to_ptr.vmem [resolvable:$true] %s104_s1 }
   0xb   :  { %v83_v34 = vld [vmem:[#allocation2] sm:$0x1] }
  0x18   :  { %67 = vperm.xlu0 %132, %v53_v3  }
  0x77   :  { %v57_v4 = vpop.xlane.xlu0 %56 }
  0x78   :  { %v58_v5 = vsub.f32 %v52_v0, %v57_v4 }
  0x7a   :  { %v59_v6 = vmul.f32 1.442695, %v58_v5 }
  0x7c   :  { %133 = vpow2.f32 %v59_v6 }
  0x82   :  { %v134_v7 = vpop.eup %133 }
  0x83   :  { %v61_v8 = vsel %vm54_vm0, %v134_v7, 0.0 }
  0x84   :  { %62 = vadd.xlane.f32.xlu1 %v61_v8 }
  0x8a   :  { %v68_v11 = vpop.permute.xlu0 %67 }
  0x8b   :  { %vm69_vm1 = vcmp.eq.s32.totalorder %v65_v10, %v68_v11 }
  0x8c   :  { %v70_v12 = vsel %vm69_vm1, %v58_v5, 0.0 }
  0x8d   :  { %v71_v13 = vsel %vm54_vm0, %v70_v12, 0.0 }
  0x8e   :  { %72 = vadd.xlane.f32.xlu1 %v71_v13 }
  0xf7   :  { %v63_v14 = vpop.xlane.xlu1 %62 }
  0xf8   :  { %135 = vlog2.f32 %v63_v14 }
  0xfe   :  { %v136_v15 = vpop.eup %135 }
  0xff   :  { %v75_v16 = vmul.f32 0.6931472, %v136_v15 }
 0x101   :  { %v73_v17 = vpop.xlane.xlu1 %72 }
 0x102   :  { %v76_v18 = vsub.f32 %v75_v16, %v73_v17 }
 0x104   :  { %v77_v19 = vsub.f32 0.0, %v76_v18 }
 0x106   :  { %v78_v20 = vmul.f32 1.442695, %v77_v19 }
 0x108   :  { %137 = vpow2.f32 %v78_v20 }
 0x10e   :  { %v138_v21 = vpop.eup %137 }
 0x10f   :  { %v80_v22 = vsub.f32 1.0, %v138_v21 }
 0x111   :  { %v81_v23 = vmul.f32 %v80_v22, %v80_v22 }
 0x113   :  { %v82_v24 = vmul.f32 %v81_v23, %v76_v18 }
 0x115   :  { %v85_v25 = vsel %vm84_vm2, %v82_v24, 0.0 }
 0x116   :  { %86 = vadd.xlane.f32.xlu2 %v85_v25 }
 0x189   :  { %v87_v27 = vpop.xlane.xlu2 %86 }
 0x18a   :  { %v88_v28 = vrot.slane %v87_v27, 4 }
 0x18c   :  { %v89_v29 = vadd.f32 %v88_v28, %v87_v27 }
 0x18e   :  { %v90_v30 = vrot.slane %v89_v29, 2 }
 0x190   :  { %v91_v31 = vadd.f32 %v90_v30, %v89_v29 }
 0x192   :  { %v92_v32 = vrot.slane %v91_v31, 1 }
 0x194   :  { %v93_v33 = vadd.f32 %v92_v32, %v91_v31 }
 0x196   :  { %127 = vpush %v93_v33 }
 0x1c7   :  { %s128_s16 = spop %127 }
 0x1c8   :  { %v95_v35 = vstv %s128_s16 }
 0x1c9   :  { %v96_v36 = vadd.f32 %v95_v35, %v83_v34 }
 0x1cb   :  { %98 = vst.msk [vmem:[#allocation2] sm:$0x1] %vm50_vm3, %v96_v36 }
 0x1cc   :  { %109 = dma.vmem_to_hbm [thread:$0]  %s105_s1, 16, %s107_s15, [#allocation3]  }
 0x1cd   :  { %163 = dma.done.wait [#allocation3], 16  }
 0x1ce   :  { %164 = vsyncadd [#allocation3], 4294967280 }
 0x1cf   :  { %114 = vsyncpa [#allocation3], 1 }

</bundles_post_ra>
